<compile_context>
chip_gen: v6e
topology: v6e:2x2x1
jax: 0.10.0
libtpu: 0.0.40
codegen_flags: <defaults>
</compile_context>

<pallas_src>
import functools

import numpy as np
import jax
import jax.numpy as jnp
from jax.experimental import pallas as pl
from jax.experimental.pallas import tpu as pltpu


def _bilinear_weight_matrix(out_size: int, in_size: int) -> np.ndarray:
    """Dense (out_size, in_size) 1-D interpolation matrix, align_corners=False."""
    if out_size == in_size:
        return np.eye(in_size, dtype=np.float32)
    scale = in_size / out_size
    idx = np.arange(out_size, dtype=np.float64)
    src = np.maximum((idx + 0.5) * scale - 0.5, 0.0)
    i0 = np.minimum(np.floor(src).astype(np.int64), in_size - 1)
    i1 = np.minimum(i0 + 1, in_size - 1)
    frac = src - i0.astype(np.float64)
    w = np.zeros((out_size, in_size), dtype=np.float32)
    rows = np.arange(out_size)
    np.add.at(w, (rows, i0), (1.0 - frac).astype(np.float32))
    np.add.at(w, (rows, i1), frac.astype(np.float32))
    return w


def _compute_resize_geometry(h, w, new_w, new_h):
    """Mirror of the original forward(): resized (h_r, w_r) and pad (l,t,r,b)."""
    pad = [0, 0, 0, 0]
    if h / w < new_h / new_w:
        h_r = int(h * (new_w / w))
        w_r = int(new_w)
        pad[1] = int((new_h - h_r) / 2)
        pad[3] = new_h - pad[1] - h_r
    else:
        w_r = int(w * (new_h / h))
        h_r = int(new_h)
        pad[0] = int((new_w - w_r) / 2)
        pad[2] = new_w - pad[0] - w_r
    return h_r, w_r, pad


@functools.lru_cache(maxsize=64)
def _padded_weight_matrices(h, w, new_w, new_h, compute_dtype):
    """Weights with center-padding baked in as zero rows / columns.

    Returns:
      wy  : (new_h, h)  device array in compute_dtype
      wxt : (w, new_w)  device array in compute_dtype
    """
    h_r, w_r, pad = _compute_resize_geometry(h, w, new_w, new_h)
    pad_left, pad_top = pad[0], pad[1]
    wy = np.zeros((new_h, h), dtype=np.float32)
    wy[pad_top:pad_top + h_r, :] = _bilinear_weight_matrix(h_r, h)
    wxt = np.zeros((w, new_w), dtype=np.float32)
    wxt[:, pad_left:pad_left + w_r] = _bilinear_weight_matrix(w_r, w).T
    return (jnp.asarray(wy, dtype=compute_dtype),
            jnp.asarray(wxt, dtype=compute_dtype))


def _resize_pad_kernel(img_ref, wy_ref, wxt_ref, out_ref, *, col_first,
                       compute_dtype):
    # img_ref:  (cg, H, W)        a group of channel planes
    # wy_ref:   (new_h, H)        row-interp matrix (padding baked in)
    # wxt_ref:  (W, new_w)        col-interp matrix, transposed (padding baked in)
    # out_ref:  (cg, new_h, new_w)
    wy = wy_ref[...]
    wxt = wxt_ref[...]
    cg = img_ref.shape[0]
    for ci in range(cg):  # static unroll: a few channels per grid step
        plane = img_ref[ci].astype(compute_dtype)
        if col_first:
            tmp = jnp.dot(plane, wxt, preferred_element_type=jnp.float32)
            res = jnp.dot(wy, tmp.astype(compute_dtype),
                          preferred_element_type=jnp.float32)
        else:
            tmp = jnp.dot(wy, plane, preferred_element_type=jnp.float32)
            res = jnp.dot(tmp.astype(compute_dtype), wxt,
                          preferred_element_type=jnp.float32)
        out_ref[ci] = res.astype(out_ref.dtype)


class ResizePadPilPallas:
    """JAX/Pallas equivalent of ResizePadPil for CHW (or HW) float tensors."""

    def __init__(self, size, compute_dtype=None):
        # size = (new_w, new_h), same convention as the PyTorch module.
        self.size = size
        self.compute_dtype = compute_dtype  # None = auto (bf16 for bf16/f16 in)

    def __call__(self, img: jnp.ndarray) -> jnp.ndarray:
        new_w, new_h = self.size

        squeeze_channel = False
        if img.ndim == 2:
            img = img[None, :, :]
            squeeze_channel = True
        elif img.ndim == 4:
            raise ValueError("batch image is not support")
        elif img.ndim != 3:
            raise ValueError("incorrect image data")

        c, h, w = img.shape

        if jnp.issubdtype(img.dtype, jnp.floating):
            out_dtype = img.dtype
        else:
            # TODO(synk): integer (uint8) rounding semantics of torchvision
            # are not reproduced; emit float32 instead.
            out_dtype = jnp.dtype(jnp.float32)

        if self.compute_dtype is not None:
            compute_dtype = np.dtype(self.compute_dtype)
        elif img.dtype in (jnp.bfloat16, jnp.float16):
            compute_dtype = np.dtype(jnp.bfloat16)  # MXU-native, f32 accumulate
        else:
            compute_dtype = np.dtype(jnp.float32)

        wy, wxt = _padded_weight_matrices(h, w, new_w, new_h, compute_dtype)

        # Run the size-reducing pass first -> smaller f32 intermediate.
        col_first = (h * new_w) <= (new_h * w)

        # Channel-group size: largest divisor of c (capped to bound unrolling)
        # whose double-buffered VMEM footprint fits a conservative budget
        # (stays under the default scoped VMEM limit on v5e/v6e/v7x).
        in_bytes = np.dtype(img.dtype).itemsize
        out_bytes = np.dtype(out_dtype).itemsize
        wt_bytes = compute_dtype.itemsize
        weights_vmem = 2 * (new_h * h + w * new_w) * wt_bytes
        inter_elems = (h * new_w) if col_first else (new_h * w)
        budget = 16 * 1024 * 1024
        cg = 1
        for cand in range(min(c, 8), 0, -1):
            if c % cand:
                continue
            need = (2 * cand * h * w * in_bytes
                    + 2 * cand * new_h * new_w * out_bytes
                    + cand * h * w * wt_bytes
                    + inter_elems * (4 + wt_bytes)
                    + weights_vmem)
            if need <= budget:
                cg = cand
                break
        # TODO(synk): if even cg=1 exceeds the budget (multi-k planes),
        # additionally row-tile the output (grid over new_h tiles).

        flops_per_c = (2 * h * w * new_w + 2 * new_h * h * new_w) if col_first \
            else (2 * new_h * h * w + 2 * new_h * w * new_w)
        cost = pl.CostEstimate(
            flops=c * flops_per_c,
            transcendentals=0,
            bytes_accessed=(c * h * w * in_bytes
                            + c * new_h * new_w * out_bytes
                            + (new_h * h + w * new_w) * wt_bytes))

        kernel = functools.partial(_resize_pad_kernel,
                                   col_first=col_first,
                                   compute_dtype=compute_dtype)

        out = pl.pallas_call(
            kernel,
            out_shape=jax.ShapeDtypeStruct((c, new_h, new_w), out_dtype),
            grid=(c // cg,),
            in_specs=[
                pl.BlockSpec((cg, h, w), lambda g: (g, 0, 0)),
                pl.BlockSpec((new_h, h), lambda g: (0, 0)),
                pl.BlockSpec((w, new_w), lambda g: (0, 0)),
            ],
            out_specs=pl.BlockSpec((cg, new_h, new_w), lambda g: (g, 0, 0)),
            compiler_params=pltpu.CompilerParams(
                dimension_semantics=("parallel",)),
            cost_estimate=cost,
        )(img, wy, wxt)

        if squeeze_channel:
            out = out[0]
        return out


def _reference_resize_pad(img, size):
    """Pure-JAX reference (resize then pad, independent code path)."""
    new_w, new_h = size
    c, h, w = img.shape
    h_r, w_r, pad = _compute_resize_geometry(h, w, new_w, new_h)
    wy = jnp.asarray(_bilinear_weight_matrix(h_r, h))
    wx = jnp.asarray(_bilinear_weight_matrix(w_r, w))
    res = jnp.einsum('ij,cjk,lk->cil', wy, img.astype(jnp.float32), wx)
    return jnp.pad(res, ((0, 0), (pad[1], pad[3]), (pad[0], pad[2])))


if __name__ == "__main__":
    key = jax.random.PRNGKey(0)
    # Small CHW image, wider than the target aspect ratio -> top/bottom padding.
    C, H, W = 3, 16, 24
    size = (32, 32)  # (new_w, new_h)
    img = jax.random.uniform(key, (C, H, W), dtype=jnp.float32)

    module = ResizePadPilPallas(size)
    out = jax.block_until_ready(module(img))

    ref = jax.block_until_ready(_reference_resize_pad(img, size))
    assert out.shape == (C, size[1], size[0]), out.shape
    assert out.dtype == img.dtype, out.dtype
    assert jnp.allclose(out, ref, atol=1e-5, rtol=1e-5), \
        float(jnp.max(jnp.abs(out - ref)))

    print("KERNEL_OK")
</pallas_src>

<mosaic_0001>
module attributes {stable_mosaic.version = 11 : i64} {
  func.func @_resize_pad_kernel(%arg0: i32, %arg1: memref<3x16x24xf32, #tpu.memory_space<vmem>>, %arg2: memref<32x16xf32, #tpu.memory_space<vmem>>, %arg3: memref<24x32xf32, #tpu.memory_space<vmem>>, %arg4: memref<3x32x32xf32, #tpu.memory_space<vmem>>) attributes {dimension_semantics = [#tpu.dimension_semantics<parallel>], iteration_bounds = array<i64: 1>, scalar_prefetch = 0 : i64, scratch_operands = 0 : i64, tpu.core_type = #tpu.core_type<tc>, window_params = [{transform_indices = @transform_0, window_bounds = array<i64: 3, 16, 24>}, {pipeline_mode = #tpu.pipeline_mode<synchronous>, transform_indices = @transform_1, window_bounds = array<i64: 32, 16>}, {pipeline_mode = #tpu.pipeline_mode<synchronous>, transform_indices = @transform_2, window_bounds = array<i64: 24, 32>}, {transform_indices = @transform_3, window_bounds = array<i64: 3, 32, 32>}]} {
    %c0 = arith.constant 0 : index
    %c0_0 = arith.constant 0 : index
    %0 = vector.load %arg2[%c0, %c0_0] : memref<32x16xf32, #tpu.memory_space<vmem>>, vector<32x16xf32>
    %c0_1 = arith.constant 0 : index
    %c0_2 = arith.constant 0 : index
    %1 = vector.load %arg3[%c0_1, %c0_2] : memref<24x32xf32, #tpu.memory_space<vmem>>, vector<24x32xf32>
    %c0_3 = arith.constant 0 : index
    %c0_4 = arith.constant 0 : index
    %c0_5 = arith.constant 0 : index
    %2 = vector.load %arg1[%c0_3, %c0_4, %c0_5] : memref<3x16x24xf32, #tpu.memory_space<vmem>>, vector<1x16x24xf32>
    %3 = vector.shape_cast %2 : vector<1x16x24xf32> to vector<16x24xf32>
    %cst = arith.constant dense<0.000000e+00> : vector<16x32xf32>
    %4 = tpu.matmul %3, %1, %cst {dimension_numbers = #tpu.dot_dimension_numbers<[1], [0], [0], [1], [0, 0, 1, 1], [], []>} : vector<16x24xf32>, vector<24x32xf32>, vector<16x32xf32> -> vector<16x32xf32>
    %cst_6 = arith.constant dense<0.000000e+00> : vector<32x32xf32>
    %5 = tpu.matmul %0, %4, %cst_6 {dimension_numbers = #tpu.dot_dimension_numbers<[1], [0], [0], [1], [0, 0, 1, 1], [], []>} : vector<32x16xf32>, vector<16x32xf32>, vector<32x32xf32> -> vector<32x32xf32>
    %c0_7 = arith.constant 0 : index
    %c0_8 = arith.constant 0 : index
    %c0_9 = arith.constant 0 : index
    %6 = vector.load %arg4[%c0_7, %c0_8, %c0_9] : memref<3x32x32xf32, #tpu.memory_space<vmem>>, vector<1x32x32xf32>
    %7 = vector.shape_cast %6 : vector<1x32x32xf32> to vector<32x32xf32>
    %8 = vector.shape_cast %5 : vector<32x32xf32> to vector<1x32x32xf32>
    tpu.vector_store %arg4[%c0_7, %c0_8, %c0_9], %8 {strides = array<i32>} : memref<3x32x32xf32, #tpu.memory_space<vmem>>, vector<1x32x32xf32>,
    %c1 = arith.constant 1 : index
    %c0_10 = arith.constant 0 : index
    %c0_11 = arith.constant 0 : index
    %9 = vector.load %arg1[%c1, %c0_10, %c0_11] : memref<3x16x24xf32, #tpu.memory_space<vmem>>, vector<1x16x24xf32>
    %10 = vector.shape_cast %9 : vector<1x16x24xf32> to vector<16x24xf32>
    %cst_12 = arith.constant dense<0.000000e+00> : vector<16x32xf32>
    %11 = tpu.matmul %10, %1, %cst_12 {dimension_numbers = #tpu.dot_dimension_numbers<[1], [0], [0], [1], [0, 0, 1, 1], [], []>} : vector<16x24xf32>, vector<24x32xf32>, vector<16x32xf32> -> vector<16x32xf32>
    %cst_13 = arith.constant dense<0.000000e+00> : vector<32x32xf32>
    %12 = tpu.matmul %0, %11, %cst_13 {dimension_numbers = #tpu.dot_dimension_numbers<[1], [0], [0], [1], [0, 0, 1, 1], [], []>} : vector<32x16xf32>, vector<16x32xf32>, vector<32x32xf32> -> vector<32x32xf32>
    %c1_14 = arith.constant 1 : index
    %c0_15 = arith.constant 0 : index
    %c0_16 = arith.constant 0 : index
    %13 = vector.load %arg4[%c1_14, %c0_15, %c0_16] : memref<3x32x32xf32, #tpu.memory_space<vmem>>, vector<1x32x32xf32>
    %14 = vector.shape_cast %13 : vector<1x32x32xf32> to vector<32x32xf32>
    %15 = vector.shape_cast %12 : vector<32x32xf32> to vector<1x32x32xf32>
    tpu.vector_store %arg4[%c1_14, %c0_15, %c0_16], %15 {strides = array<i32>} : memref<3x32x32xf32, #tpu.memory_space<vmem>>, vector<1x32x32xf32>,
    %c2 = arith.constant 2 : index
    %c0_17 = arith.constant 0 : index
    %c0_18 = arith.constant 0 : index
    %16 = vector.load %arg1[%c2, %c0_17, %c0_18] : memref<3x16x24xf32, #tpu.memory_space<vmem>>, vector<1x16x24xf32>
    %17 = vector.shape_cast %16 : vector<1x16x24xf32> to vector<16x24xf32>
    %cst_19 = arith.constant dense<0.000000e+00> : vector<16x32xf32>
    %18 = tpu.matmul %17, %1, %cst_19 {dimension_numbers = #tpu.dot_dimension_numbers<[1], [0], [0], [1], [0, 0, 1, 1], [], []>} : vector<16x24xf32>, vector<24x32xf32>, vector<16x32xf32> -> vector<16x32xf32>
    %cst_20 = arith.constant dense<0.000000e+00> : vector<32x32xf32>
    %19 = tpu.matmul %0, %18, %cst_20 {dimension_numbers = #tpu.dot_dimension_numbers<[1], [0], [0], [1], [0, 0, 1, 1], [], []>} : vector<32x16xf32>, vector<16x32xf32>, vector<32x32xf32> -> vector<32x32xf32>
    %c2_21 = arith.constant 2 : index
    %c0_22 = arith.constant 0 : index
    %c0_23 = arith.constant 0 : index
    %20 = vector.load %arg4[%c2_21, %c0_22, %c0_23] : memref<3x32x32xf32, #tpu.memory_space<vmem>>, vector<1x32x32xf32>
    %21 = vector.shape_cast %20 : vector<1x32x32xf32> to vector<32x32xf32>
    %22 = vector.shape_cast %19 : vector<32x32xf32> to vector<1x32x32xf32>
    tpu.vector_store %arg4[%c2_21, %c0_22, %c0_23], %22 {strides = array<i32>} : memref<3x32x32xf32, #tpu.memory_space<vmem>>, vector<1x32x32xf32>,
    return
  }
  func.func @transform_0(%arg0: i32) -> (i32, i32, i32) {
    %c0_i32 = arith.constant 0 : i32
    %c0_i32_0 = arith.constant 0 : i32
    %c0_i32_1 = arith.constant 0 : i32
    return %arg0, %c0_i32, %c0_i32_0 : i32, i32, i32
  }
  func.func @transform_1(%arg0: i32) -> (i32, i32) {
    %c0_i32 = arith.constant 0 : i32
    %c0_i32_0 = arith.constant 0 : i32
    %c0_i32_1 = arith.constant 0 : i32
    return %c0_i32, %c0_i32_0 : i32, i32
  }
  func.func @transform_2(%arg0: i32) -> (i32, i32) {
    %c0_i32 = arith.constant 0 : i32
    %c0_i32_0 = arith.constant 0 : i32
    %c0_i32_1 = arith.constant 0 : i32
    return %c0_i32, %c0_i32_0 : i32, i32
  }
  func.func @transform_3(%arg0: i32) -> (i32, i32, i32) {
    %c0_i32 = arith.constant 0 : i32
    %c0_i32_0 = arith.constant 0 : i32
    %c0_i32_1 = arith.constant 0 : i32
    return %arg0, %c0_i32, %c0_i32_0 : i32, i32, i32
  }
}

</mosaic_0001>

<bundles_post_ra>
// kernel: tpu_custom_call.1
= control target key start
LH: loop header
LB: loop body
LE: loop exit
PB: predicated region body
PF: predicated region fallthrough
CT: control target
= control target key end

     0   :  { %8 = vsyncpa [#allocation3], 0  ;;  %s848_s0 = inlined_call_operand.vmem [shape: f32[3,16,24], index: 0, kind: input, shape index: {}]   ;;  %s849_s1 = inlined_call_operand.vmem [shape: f32[32,16], index: 1, kind: input, shape index: {}]   ;;  %s850_s2 = inlined_call_operand.hbm [shape: f32[24,32], index: 2, kind: input, shape index: {}]   ;;  %s851_s3 = inlined_call_operand.hbm [shape: f32[3,32,32], index: 3, kind: output, shape index: {}]  }
   0x1   :  { %9 = vsyncpa [#allocation4], 0  ;;  %s752_s12 = smov [#allocation2]  }
   0x2   :  { %s19_s13 = sshll.u32 %s752_s12, 4  ;;  %s20_s13 = int_to_ptr.vmem [resolvable:$true] %s19_s13 }
   0x3   :  { %s716_s14 = scalar_lea.vmem %s20_s13, 384  ;;  %p721_p1 = scmp.lt.s32.totalorder %s20_s13, %s20_s13 }
   0x4   :  { %p717_p0 = scmp.ne.s32.totalorder %s20_s13, %s716_s14  ;;  %p722_p2 = scmp.lt.s32.totalorder %s716_s14, %s716_s14 }
   0x6   :  { %p723_p3 = por %p722_p2, %p721_p1 }
   0x8   :  { %p724_p4 = pnand %p723_p3, %p717_p0 }
   0xa   :  { %727 = shalt.err (!%p724_p4)
}
   0xb   :  { %s753_s15 = smov 128   ;;  %s754_s16 = smov 8  }
   0xc   :  { %25 = dma.hbm_to_vmem [thread:$0]  %s850_s2, 384, %s20_s13, [#allocation3], %s753_s15, %s753_s15, %s754_s16  }
   0xd   :  { %748 = dma.done.wait [#allocation3], 384  }
   0xe   :  { %749 = vsyncadd [#allocation3], 4294966912  ;;  %vm38_vm0 = vcmask 195584   ;;  %v35_v0 = vld [vmem:[#allocation2 + $0x10] sm:$0xff]  ;;  %v34_v1 = vld [vmem:[#allocation2 + $0x8] sm:$0xff]  ;;  %vm120_vm1 = vcmask 130048  }
   0xf   :  { %643 = vmatprep.subr.mxu0 %v35_v0  ;;  %v36_v2 = vld [vmem:[%s848_s0] sm:$0xff]  ;;  %v37_v4 = vld [vmem:[%s848_s0 + $0x8] sm:$0xff]  ;;  %v594_v9 = vld [vmem:[%s848_s0 + $0x10] sm:$0xff]  ;;  %vm218_vm2 = vcmask 261120  }
  0x10   :  { %644 = vmatpush3.msra.mxu0 %v35_v0  ;;  %v33_v3 = vld [vmem:[#allocation2] sm:$0xff]  ;;  %649 = vmatprep.mubr.msk.f32.mxu0 %vm38_vm0, %v36_v2  ;;  %v30_v8 = vld [vmem:[%s849_s1 + $0x8] sm:$0xff]  ;;  %v595_v10 = vld [vmem:[%s848_s0 + $0x18] sm:$0xff] }
  0x11   :  { %645 = vmatprep.subr.mxu0 %v34_v1  ;;  %v29_v5 = vld [vmem:[%s849_s1] sm:$0xff]  ;;  %v603_v12 = vld [vmem:[%s848_s0 + $0x28] sm:$0xff]  ;;  %v31_v13 = vld [vmem:[%s849_s1 + $0x10] sm:$0xff] }
  0x12   :  { %646 = vmatpush3.msra.mxu0 %v34_v1  ;;  %v602_v11 = vld [vmem:[%s848_s0 + $0x20] sm:$0xff]  ;;  %659 = vmatprep.mubr.msk.f32.mxu1 %vm120_vm1, %v31_v13  ;;  %v32_v14 = vld [vmem:[%s849_s1 + $0x18] sm:$0xff]  ;;  %s755_s0 = smov [#allocation5]  }
  0x13   :  { %647 = vmatprep.subr.mxu0 %v33_v3  ;;  %s576_s1 = sshll.u32 %s755_s0, 4  ;;  %s577_s1 = int_to_ptr.vmem [resolvable:$true] %s576_s1 }
  0x14   :  { %648 = vmatpush3.msra.mxu0 %v33_v3  ;;  %s728_s11 = scalar_lea.vmem %s577_s1, 1536  ;;  %p733_p6 = scmp.lt.s32.totalorder %s577_s1, %s577_s1 }
  0x15   :  { %650 = vmatmul.mubr.msk.f32.vlgmr.msra.gmra.mxu0 %vm38_vm0, %v37_v4  ;;  %p729_p5 = scmp.ne.s32.totalorder %s577_s1, %s728_s11  ;;  %p734_p7 = scmp.lt.s32.totalorder %s728_s11, %s728_s11 }
  0x16   :  { %656 = vmatprep.mubr.msk.f32.mxu0 %vm120_vm1, %v29_v5 }
  0x17   :  { %p735_p8 = por %p734_p7, %p733_p6 }
  0x19   :  { %p736_p9 = pnand %p735_p8, %p729_p5 }
  0xd5   :  { %v651_v6 = vpop.f32.mrf.mxu0 }
  0xd6   :  { %652 = vmatprep.subr.mxu0 %v651_v6  ;;  %700 = vmatprep.subr.mxu1 %v651_v6 }
  0xd7   :  { %v111_v7 = vpop.f32.mrf.mxu0  ;;  %653 = vmatpush3.msra.mxu0 %v651_v6  ;;  %702 = vmatpush3.msra.mxu1 %v651_v6 }
  0xd8   :  { %654 = vmatprep.subr.mxu0 %v111_v7  ;;  %701 = vmatprep.subr.mxu1 %v111_v7 }
  0xd9   :  { %655 = vmatpush3.msra.mxu0 %v111_v7  ;;  %703 = vmatpush3.msra.mxu1 %v111_v7 }
  0xda   :  { %657 = vmatmul.mubr.msk.f32.vlgmr.msra.gmra.mxu0 %vm120_vm1, %v30_v8  ;;  %662 = vmatprep.subr.mxu0 %v35_v0 }
  0xdb   :  { %663 = vmatpush3.msra.mxu0 %v35_v0  ;;  %668 = vmatprep.mubr.msk.f32.mxu0 %vm38_vm0, %v594_v9 }
  0xdc   :  { %664 = vmatprep.subr.mxu0 %v34_v1  ;;  %660 = vmatmul.mubr.msk.f32.vlgmr.msra.gmra.mxu1 %vm120_vm1, %v32_v14 }
  0xdd   :  { %665 = vmatpush3.msra.mxu0 %v34_v1  ;;  %675 = vmatprep.mubr.msk.f32.mxu1 %vm120_vm1, %v29_v5 }
  0xde   :  { %666 = vmatprep.subr.mxu0 %v33_v3 }
  0xdf   :  { %667 = vmatpush3.msra.mxu0 %v33_v3 }
  0xe0   :  { %669 = vmatmul.mubr.msk.f32.vlgmr.msra.gmra.mxu0 %vm38_vm0, %v595_v10  ;;  %681 = vmatprep.subr.mxu0 %v35_v0 }
  0xe1   :  { %682 = vmatpush3.msra.mxu0 %v35_v0  ;;  %687 = vmatprep.mubr.msk.f32.mxu0 %vm38_vm0, %v602_v11 }
  0xe2   :  { %683 = vmatprep.subr.mxu0 %v34_v1 }
  0xe3   :  { %684 = vmatpush3.msra.mxu0 %v34_v1 }
  0xe4   :  { %685 = vmatprep.subr.mxu0 %v33_v3 }
  0xe5   :  { %686 = vmatpush3.msra.mxu0 %v33_v3 }
  0xe6   :  { %688 = vmatmul.mubr.msk.f32.vlgmr.msra.gmra.mxu0 %vm38_vm0, %v603_v12 }
 0x19a   :  { %v658_v15 = vpop.f32.mrf.mxu0 }
 0x19b   :  { %220 = vst.msk [vmem:[#allocation5 + $0x8] sm:$0xff] %vm218_vm2, %v658_v15 }
 0x19c   :  { %v199_v16 = vpop.f32.mrf.mxu0  ;;  %v661_v21 = vpop.f32.mrf.mxu1 }
 0x19d   :  { %219 = vst.msk [vmem:[#allocation5] sm:$0xff] %vm218_vm2, %v199_v16  ;;  %222 = vst.msk [vmem:[#allocation5 + $0x18] sm:$0xff] %vm218_vm2, %v661_v21 }
 0x19e   :  { %v209_v22 = vpop.f32.mrf.mxu1 }
 0x19f   :  { %221 = vst.msk [vmem:[#allocation5 + $0x10] sm:$0xff] %vm218_vm2, %v209_v22 }
 0x1a0   :  { %v670_v17 = vpop.f32.mrf.mxu0 }
 0x1a1   :  { %671 = vmatprep.subr.mxu1 %v670_v17 }
 0x1a2   :  { %v298_v18 = vpop.f32.mrf.mxu0  ;;  %672 = vmatpush3.msra.mxu1 %v670_v17 }
 0x1a3   :  { %673 = vmatprep.subr.mxu1 %v298_v18 }
 0x1a4   :  { %674 = vmatpush3.msra.mxu1 %v298_v18 }
 0x1a5   :  { %676 = vmatmul.mubr.msk.f32.vlgmr.msra.gmra.mxu1 %vm120_vm1, %v30_v8 }
 0x1a6   :  { %v689_v19 = vpop.f32.mrf.mxu0  ;;  %678 = vmatprep.mubr.msk.f32.mxu1 %vm120_vm1, %v31_v13 }
 0x1a7   :  { %690 = vmatprep.subr.mxu1 %v689_v19 }
 0x1a8   :  { %v472_v20 = vpop.f32.mrf.mxu0  ;;  %691 = vmatpush3.msra.mxu1 %v689_v19 }
 0x1a9   :  { %692 = vmatprep.subr.mxu1 %v472_v20  ;;  %679 = vmatmul.mubr.msk.f32.gmra.mxu1 %vm120_vm1, %v32_v14 }
 0x1aa   :  { %693 = vmatpush3.msra.mxu1 %v472_v20  ;;  %694 = vmatprep.mubr.msk.f32.mxu1 %vm120_vm1, %v29_v5 }
 0x1ad   :  { %695 = vmatmul.mubr.msk.f32.vlgmr.msra.gmra.mxu1 %vm120_vm1, %v30_v8 }
 0x1ae   :  { %697 = vmatprep.mubr.msk.f32.mxu1 %vm120_vm1, %v31_v13 }
 0x1b1   :  { %698 = vmatmul.mubr.msk.f32.gmra.mxu1 %vm120_vm1, %v32_v14 }
 0x265   :  { %v677_v23 = vpop.f32.mrf.mxu1 }
 0x266   :  { %394 = vst.msk [vmem:[#allocation5 + $0x28] sm:$0xff] %vm218_vm2, %v677_v23 }
 0x267   :  { %v373_v24 = vpop.f32.mrf.mxu1 }
 0x268   :  { %393 = vst.msk [vmem:[#allocation5 + $0x20] sm:$0xff] %vm218_vm2, %v373_v24 }
 0x269   :  { %v680_v25 = vpop.f32.mrf.mxu1 }
 0x26a   :  { %396 = vst.msk [vmem:[#allocation5 + $0x38] sm:$0xff] %vm218_vm2, %v680_v25 }
 0x26b   :  { %v383_v26 = vpop.f32.mrf.mxu1 }
 0x26c   :  { %395 = vst.msk [vmem:[#allocation5 + $0x30] sm:$0xff] %vm218_vm2, %v383_v26 }
 0x26d   :  { %v696_v27 = vpop.f32.mrf.mxu1 }
 0x26e   :  { %568 = vst.msk [vmem:[#allocation5 + $0x48] sm:$0xff] %vm218_vm2, %v696_v27 }
 0x26f   :  { %v547_v28 = vpop.f32.mrf.mxu1 }
 0x270   :  { %567 = vst.msk [vmem:[#allocation5 + $0x40] sm:$0xff] %vm218_vm2, %v547_v28 }
 0x271   :  { %v699_v29 = vpop.f32.mrf.mxu1 }
 0x272   :  { %570 = vst.msk [vmem:[#allocation5 + $0x58] sm:$0xff] %vm218_vm2, %v699_v29 }
 0x273   :  { %v557_v30 = vpop.f32.mrf.mxu1 }
 0x274   :  { %569 = vst.msk [vmem:[#allocation5 + $0x50] sm:$0xff] %vm218_vm2, %v557_v30 }
 0x275   :  { %739 = shalt.err (!%p736_p9)
}
 0x276   :  { %582 = dma.vmem_to_hbm [thread:$0]  %s577_s1, 1536, %s851_s3, [#allocation4], %s753_s15, %s753_s15, %s754_s16  }
 0x277   :  { %750 = dma.done.wait [#allocation4], 1536  }
 0x278   :  { %751 = vsyncadd [#allocation4], 4294965760 }
 0x279   :  { %586 = vsyncpa [#allocation3], 1 }
 0x27a   :  { %587 = vsyncpa [#allocation4], 1 }

</bundles_post_ra>
